<compile_context>
chip_gen: v7x
topology: tpu7x:2x2x1
jax: 0.10.0
libtpu: 0.0.40
codegen_flags: <defaults>
</compile_context>

<pallas_src>
import jax
import jax.numpy as jnp
from jax.experimental import pallas as pl
from jax.experimental.pallas import tpu as pltpu


def _mlp_kernel(xT_ref, w0_ref, b0_ref, w1_ref, b1_ref, oT_ref):
    xT = xT_ref[...]                     # (3, TB)  features on sublanes, batch on lanes
    w0 = w0_ref[...]                     # (E, 3)   PyTorch linear0.weight layout
    w1 = w1_ref[...]                     # (2, E)   PyTorch linear1.weight layout

    # Layer 0 on the MXU: (E,3) @ (3,TB) -> (E,TB); bias + ReLU on the VPU.
    h = jnp.dot(w0, xT, preferred_element_type=jnp.float32) + b0_ref[...]
    h = jnp.maximum(h, 0.0)

    # Layer 1 on the MXU: (2,E) @ (E,TB) -> (2,TB); bias fused into the store.
    out = jnp.dot(w1, h, preferred_element_type=jnp.float32) + b1_ref[...]
    oT_ref[...] = out.astype(oT_ref.dtype)


def _round_up(n, m):
    return ((n + m - 1) // m) * m


def _choose_tile_b(B):
    # Single grid step when small (block == full array extent is always legal).
    if B <= 1024:
        return B
    # Otherwise aim for an even, >= 2-step grid (megacore on v7x) with tiles
    # large enough to amortize the ~0.35us per-grid-step overhead.
    return min(_round_up(pl.cdiv(B, 2), 128), 8192)


@jax.jit
def mlp_forward(x, w0, b0, w1, b1):
    """x: (B, 3) f32 -> (B, 2).  w0: (E, 3), b0: (E, 1), w1: (2, E), b1: (2, 1)."""
    B = x.shape[0]
    E = w0.shape[0]
    tb = _choose_tile_b(B)
    grid = (pl.cdiv(B, tb),)

    xT = x.T                               # tiny relayout, fused under jit
    resident = lambda i: (0, 0)            # weights/biases stay in VMEM

    cost = pl.CostEstimate(
        flops=2 * B * (3 * E + E * 2),
        transcendentals=0,
        bytes_accessed=4 * (x.size + w0.size + b0.size + w1.size + b1.size + 2 * B),
    )

    oT = pl.pallas_call(
        _mlp_kernel,
        out_shape=jax.ShapeDtypeStruct((2, B), x.dtype),
        grid=grid,
        in_specs=[
            pl.BlockSpec((3, tb), lambda i: (0, i)),   # x_T, tiled on batch lanes
            pl.BlockSpec((E, 3), resident),
            pl.BlockSpec((E, 1), resident),
            pl.BlockSpec((2, E), resident),
            pl.BlockSpec((2, 1), resident),
        ],
        out_specs=pl.BlockSpec((2, tb), lambda i: (0, i)),
        compiler_params=pltpu.CompilerParams(
            dimension_semantics=("parallel",),          # batch sharded across TCs on v7x
        ),
        cost_estimate=cost,
    )(xT, w0, b0, w1, b1)
    return oT.T                                         # back to PyTorch's (B, 2)


def init_params(key, embedding_size):
    """nn.Linear-style U(-1/sqrt(fan_in), 1/sqrt(fan_in)) init, kernel layouts."""
    k0w, k0b, k1w, k1b = jax.random.split(key, 4)
    bound0 = 1.0 / jnp.sqrt(3.0)
    bound1 = 1.0 / jnp.sqrt(float(embedding_size))
    w0 = jax.random.uniform(k0w, (embedding_size, 3), jnp.float32, -bound0, bound0)
    b0 = jax.random.uniform(k0b, (embedding_size, 1), jnp.float32, -bound0, bound0)
    w1 = jax.random.uniform(k1w, (2, embedding_size), jnp.float32, -bound1, bound1)
    b1 = jax.random.uniform(k1b, (2, 1), jnp.float32, -bound1, bound1)
    return w0, b0, w1, b1


def ref_forward(x, w0, b0, w1, b1):
    return jnp.maximum(x @ w0.T + b0.T, 0.0) @ w1.T + b1.T


if __name__ == "__main__":
    key = jax.random.PRNGKey(0)
    k_in, k_param, k_big = jax.random.split(key, 3)

    embedding_size = 32
    batch = 8
    w0, b0, w1, b1 = init_params(k_param, embedding_size)

    # Small case (matches the module spec: Linear(3, E) -> ReLU -> Linear(E, 2)).
    x = jax.random.normal(k_in, (batch, 3), jnp.float32)
    out = jax.block_until_ready(mlp_forward(x, w0, b0, w1, b1))
    ref = ref_forward(x, w0, b0, w1, b1)
    assert out.shape == (batch, 2)
    assert jnp.allclose(out, ref, atol=1e-5, rtol=1e-5)

    # Larger batch exercising the tiled path (tb=1024 -> even 2-step grid).
    xb = jax.random.normal(k_big, (2048, 3), jnp.float32)
    outb = jax.block_until_ready(mlp_forward(xb, w0, b0, w1, b1))
    refb = ref_forward(xb, w0, b0, w1, b1)
    assert outb.shape == (2048, 2)
    assert jnp.allclose(outb, refb, atol=1e-4, rtol=1e-4)

    print("KERNEL_OK")
</pallas_src>

<mosaic_0001>
module attributes {stable_mosaic.version = 11 : i64} {
  func.func @_mlp_kernel(%arg0: i32, %arg1: memref<3x8xf32, #tpu.memory_space<vmem>>, %arg2: memref<32x3xf32, #tpu.memory_space<vmem>>, %arg3: memref<32x1xf32, #tpu.memory_space<vmem>>, %arg4: memref<2x32xf32, #tpu.memory_space<vmem>>, %arg5: memref<2x1xf32, #tpu.memory_space<vmem>>, %arg6: memref<2x8xf32, #tpu.memory_space<vmem>>) attributes {dimension_semantics = [#tpu.dimension_semantics<parallel>], iteration_bounds = array<i64: 1>, scalar_prefetch = 0 : i64, scratch_operands = 0 : i64, tpu.core_type = #tpu.core_type<tc>, window_params = [{transform_indices = @transform_0, window_bounds = array<i64: 3, 8>}, {pipeline_mode = #tpu.pipeline_mode<synchronous>, transform_indices = @transform_1, window_bounds = array<i64: 32, 3>}, {pipeline_mode = #tpu.pipeline_mode<synchronous>, transform_indices = @transform_2, window_bounds = array<i64: 32, 1>}, {pipeline_mode = #tpu.pipeline_mode<synchronous>, transform_indices = @transform_3, window_bounds = array<i64: 2, 32>}, {pipeline_mode = #tpu.pipeline_mode<synchronous>, transform_indices = @transform_4, window_bounds = array<i64: 2, 1>}, {transform_indices = @transform_5, window_bounds = array<i64: 2, 8>}]} {
    %c0 = arith.constant 0 : index
    %c0_0 = arith.constant 0 : index
    %0 = vector.load %arg1[%c0, %c0_0] : memref<3x8xf32, #tpu.memory_space<vmem>>, vector<3x8xf32>
    %c0_1 = arith.constant 0 : index
    %c0_2 = arith.constant 0 : index
    %1 = vector.load %arg2[%c0_1, %c0_2] : memref<32x3xf32, #tpu.memory_space<vmem>>, vector<32x3xf32>
    %c0_3 = arith.constant 0 : index
    %c0_4 = arith.constant 0 : index
    %2 = vector.load %arg4[%c0_3, %c0_4] : memref<2x32xf32, #tpu.memory_space<vmem>>, vector<2x32xf32>
    %cst = arith.constant dense<0.000000e+00> : vector<32x8xf32>
    %3 = tpu.matmul %1, %0, %cst {dimension_numbers = #tpu.dot_dimension_numbers<[1], [0], [0], [1], [0, 0, 1, 1], [], []>} : vector<32x3xf32>, vector<3x8xf32>, vector<32x8xf32> -> vector<32x8xf32>
    %c0_5 = arith.constant 0 : index
    %c0_6 = arith.constant 0 : index
    %4 = vector.load %arg3[%c0_5, %c0_6] : memref<32x1xf32, #tpu.memory_space<vmem>>, vector<32x1xf32>
    %5 = vector.broadcast %4 : vector<32x1xf32> to vector<32x8xf32>
    %6 = arith.addf %3, %5 : vector<32x8xf32>
    %cst_7 = arith.constant 0.000000e+00 : f32
    %7 = vector.broadcast %cst_7 : f32 to vector<32x8xf32>
    %8 = arith.maximumf %6, %7 : vector<32x8xf32>
    %cst_8 = arith.constant dense<0.000000e+00> : vector<2x8xf32>
    %9 = tpu.matmul %2, %8, %cst_8 {dimension_numbers = #tpu.dot_dimension_numbers<[1], [0], [0], [1], [0, 0, 1, 1], [], []>} : vector<2x32xf32>, vector<32x8xf32>, vector<2x8xf32> -> vector<2x8xf32>
    %c0_9 = arith.constant 0 : index
    %c0_10 = arith.constant 0 : index
    %10 = vector.load %arg5[%c0_9, %c0_10] : memref<2x1xf32, #tpu.memory_space<vmem>>, vector<2x1xf32>
    %11 = vector.broadcast %10 : vector<2x1xf32> to vector<2x8xf32>
    %12 = arith.addf %9, %11 : vector<2x8xf32>
    %c0_11 = arith.constant 0 : index
    %c0_12 = arith.constant 0 : index
    %13 = vector.load %arg6[%c0_11, %c0_12] : memref<2x8xf32, #tpu.memory_space<vmem>>, vector<2x8xf32>
    tpu.vector_store %arg6[%c0_11, %c0_12], %12 {strides = array<i32>} : memref<2x8xf32, #tpu.memory_space<vmem>>, vector<2x8xf32>,
    return
  }
  func.func @transform_0(%arg0: i32) -> (i32, i32) {
    %c0_i32 = arith.constant 0 : i32
    %c0_i32_0 = arith.constant 0 : i32
    return %c0_i32, %arg0 : i32, i32
  }
  func.func @transform_1(%arg0: i32) -> (i32, i32) {
    %c0_i32 = arith.constant 0 : i32
    %c0_i32_0 = arith.constant 0 : i32
    %c0_i32_1 = arith.constant 0 : i32
    return %c0_i32, %c0_i32_0 : i32, i32
  }
  func.func @transform_2(%arg0: i32) -> (i32, i32) {
    %c0_i32 = arith.constant 0 : i32
    %c0_i32_0 = arith.constant 0 : i32
    %c0_i32_1 = arith.constant 0 : i32
    return %c0_i32, %c0_i32_0 : i32, i32
  }
  func.func @transform_3(%arg0: i32) -> (i32, i32) {
    %c0_i32 = arith.constant 0 : i32
    %c0_i32_0 = arith.constant 0 : i32
    %c0_i32_1 = arith.constant 0 : i32
    return %c0_i32, %c0_i32_0 : i32, i32
  }
  func.func @transform_4(%arg0: i32) -> (i32, i32) {
    %c0_i32 = arith.constant 0 : i32
    %c0_i32_0 = arith.constant 0 : i32
    %c0_i32_1 = arith.constant 0 : i32
    return %c0_i32, %c0_i32_0 : i32, i32
  }
  func.func @transform_5(%arg0: i32) -> (i32, i32) {
    %c0_i32 = arith.constant 0 : i32
    %c0_i32_0 = arith.constant 0 : i32
    return %c0_i32, %arg0 : i32, i32
  }
}

</mosaic_0001>

<bundles_post_ra>
// kernel: mlp_forward.1
= control target key start
LH: loop header
LB: loop body
LE: loop exit
PB: predicated region body
PF: predicated region fallthrough
CT: control target
= control target key end

     0   :  { %vm64_vm0 = vcmask 1042432   ;;  %vm51_vm1 = vcmask 23552   ;;  %v325_v5 = vmov 0   ;;  %s409_s0 = inlined_call_operand.vmem [shape: f32[3,8], index: 0, kind: input, shape index: {}]   ;;  %s410_s1 = inlined_call_operand.vmem [shape: f32[32,3], index: 1, kind: input, shape index: {}]   ;;  %s411_s2 = inlined_call_operand.vmem [shape: f32[32,1], index: 2, kind: input, shape index: {}]   ;;  %s412_s3 = inlined_call_operand.vmem [shape: f32[2,32], index: 3, kind: input, shape index: {}]   ;;  %s413_s4 = inlined_call_operand.vmem [shape: f32[2,1], index: 4, kind: input, shape index: {}]   ;;  %s414_s5 = inlined_call_operand.hbm [shape: f32[2,8], index: 5, kind: output, shape index: {}]  }
   0x1   :  { %v21_v0 = vld [vmem:[%s409_s0] sm:$0x7]  ;;  %v23_v2 = vld [vmem:[%s410_s1 + $0x8] sm:$0xff]  ;;  %v24_v3 = vld [vmem:[%s410_s1 + $0x10] sm:$0xff]  ;;  %299 = vset.pattern.permute.xlu0 %v325_v5 }
   0x2   :  { %v22_v1 = vld [vmem:[%s410_s1] sm:$0xff]  ;;  %269 = vmatprep.subr.msk.mxu0 %vm64_vm0, %v21_v0  ;;  %v29_v6 = vld [vmem:[%s411_s2 + $0x10] sm:$0xff] }
   0x3   :  { %271 = vmatprep.mubr.msk.f32.mxu0 %vm51_vm1, %v22_v1  ;;  %v27_v4 = vld [vmem:[%s411_s2] sm:$0xff]  ;;  %270 = vmatpush3.msk.msra.mxu0 %vm64_vm0, %v21_v0 }
   0x4   :  { %272 = vmatmul.mubr.msk.f32.vlgmr.msra.gmra.mrb[0].mxu0 %vm51_vm1, %v23_v2  ;;  %33 = vperm.xlu0 %299, %v27_v4  }
   0x5   :  { %10 = vsyncpa [#allocation3], 0  ;;  %274 = vmatprep.mubr.msk.f32.mxu0 %vm51_vm1, %v24_v3  ;;  %v25_v7 = vld [vmem:[%s410_s1 + $0x18] sm:$0xff]  ;;  %v28_v8 = vld [vmem:[%s411_s2 + $0x8] sm:$0xff]  ;;  %300 = vset.pattern.permute.xlu1 %v325_v5  ;;  %v326_v11 = vmov 0.0|0.0   ;;  %vm327_vm2 = vmmov 0  }
   0x6   :  { %43 = vperm.xlu1 %300, %v29_v6   ;;  %v30_v9 = vld [vmem:[%s411_s2 + $0x18] sm:$0xff]  ;;  %v157_v10 = vld [vmem:[%s413_s4] sm:$0x3]  ;;  %288 = vmatprep.subr.bf16.mxu1 %v326_v11  ;;  %v328_v12 = vmov 0.0   ;;  %vm163_vm3 = vcmask 261120   ;;  %s329_s4 = smov [#allocation2]  }
   0x7   :  { %285 = vmatprep.mubr.msk.f32.mxu1 %vm327_vm2, %v328_v12  ;;  %v26_v31 = vld [vmem:[%s412_s3] sm:$0x3]  ;;  %s245_s12 = sshll.u32 %s329_s4, 4  ;;  %vm237_vm4 = vcmask 58368   ;;  %s246_s12 = int_to_ptr.vmem [resolvable:$true] %s245_s12 }
   0x8   :  { %275 = vmatmul.mubr.msk.f32.gmra.mrb[2].mxu0 %vm51_vm1, %v25_v7  ;;  %38 = vperm.xlu0 %299, %v28_v8   ;;  %s301_s13 = scalar_lea.vmem %s246_s12, 32  ;;  %p306_p1 = scmp.lt.s32.totalorder %s246_s12, %s246_s12 }
   0x9   :  { %p302_p0 = scmp.ne.s32.totalorder %s246_s12, %s301_s13  ;;  %p307_p2 = scmp.lt.s32.totalorder %s301_s13, %s301_s13 }
   0xa   :  { %48 = vperm.xlu1 %300, %v30_v9  }
   0xb   :  { %p308_p3 = por %p307_p2, %p306_p1 }
   0xc   :  { %160 = vperm.xlu0 %299, %v157_v10  }
   0xd   :  { %p309_p4 = pnand %p308_p3, %p302_p0 }
  0x83   :  { %v34_v13 = vpop.permute.xlu0 %33 }
  0x85   :  { %v44_v14 = vpop.permute.xlu1 %43 }
  0x87   :  { %v39_v15 = vpop.permute.xlu0 %38 }
  0x89   :  { %v49_v21 = vpop.permute.xlu1 %48 }
  0x8b   :  { %v161_v32 = vpop.permute.xlu0 %160 }
  0xd7   :  { %v273_v16 = vpop.f32.mrb[0].mxu0 }
  0xd8   :  { %v140_v17 = vadd.f32 %v273_v16, %v39_v15  ;;  %v134_v18 = vpop.f32.mrb[1].mxu0 }
  0xd9   :  { %v135_v19 = vadd.f32 %v134_v18, %v34_v13 }
  0xda   :  { %v154_v20 = vmax.f32 %v140_v17, 0.0 }
  0xdb   :  { %v153_v22 = vmax.f32 %v135_v19, 0.0  ;;  %v276_v23 = vpop.f32.mrb[2].mxu0 }
  0xdc   :  { %v150_v24 = vadd.f32 %v276_v23, %v49_v21  ;;  %v144_v25 = vpop.f32.mrb[3].mxu0 }
  0xdd   :  { %v145_v26 = vadd.f32 %v144_v25, %v44_v14  ;;  %v289_v27 = vpack.c.bf16 %v154_v20, %v153_v22 }
  0xde   :  { %v156_v28 = vmax.f32 %v150_v24, 0.0 }
  0xdf   :  { %v155_v29 = vmax.f32 %v145_v26, 0.0  ;;  %290 = vmatpush3.bf16.msra.mxu1 %v289_v27 }
  0xe0   :  { %291 = vmatprep.subr.bf16.mxu1 %v326_v11 }
  0xe1   :  { %v292_v30 = vpack.c.bf16 %v156_v28, %v155_v29 }
  0xe3   :  { %293 = vmatpush3.bf16.msra.mxu1 %v292_v30 }
  0xe6   :  { %286 = vmatmul.mubr.msk.f32.vlgmr.msra.gmra.mrb[0].mxu1 %vm163_vm3, %v26_v31 }
 0x1b9   :  { %v233_v33 = vpop.f32.mrb[0].mxu1 }
 0x1ba   :  { %v234_v34 = vadd.f32 %v233_v33, %v161_v32  ;;  %v287_v35 = vpop.f32.mrb[1].mxu1 }
 0x1bc   :  { %238 = vst.msk [vmem:[#allocation2] sm:$0x3] %vm237_vm4, %v234_v34 }
 0x1bd   :  { %312 = shalt.err (!%p309_p4)
}
 0x1be   :  { %s313_s15 = scalar_lea.hbm %s414_s5, 32 }
 0x1bf   :  { %p314_p5 = scmp.ne.s32.totalorder %s414_s5, %s313_s15  ;;  %p317_p6 = scmp.lt.u32.totalorder %s313_s15, %s414_s5 }
 0x1c1   :  { %p319_p7 = pnand %p317_p6, %p314_p5 }
 0x1c3   :  { %322 = shalt.err (!%p319_p7)
}
 0x1c4   :  { %248 = dma.vmem_to_hbm [thread:$0]  %s246_s12, 32, %s414_s5, [#allocation3]  }
 0x1c5   :  { %323 = dma.done.wait [#allocation3], 32  }
 0x1c6   :  { %324 = vsyncadd [#allocation3], 4294967264 }
 0x1c7   :  { %252 = vsyncpa [#allocation3], 1 }

</bundles_post_ra>
